<compile_context>
chip_gen: v7x
topology: tpu7x:2x2x1
jax: 0.10.0
libtpu: 0.0.40
codegen_flags: <defaults>
</compile_context>

<pallas_src>
import math

import jax
import jax.numpy as jnp
from jax.experimental import pallas as pl
from jax.experimental.pallas import tpu as pltpu

D_MODEL = 32
N_HEADS = 4
D_FF = 64
EPS = 1e-6  # LayerNorm eps used by the Annotated Transformer


def _choose_block_batch(B, S):
    """Batch elements per grid step.

    Aim for >=128 matmul rows (TB*S) per step, but keep >=2 grid steps when the
    batch allows so v7x's second TensorCore is used (costs nothing on v5e/v6e).
    """
    divisors = [d for d in range(1, B + 1) if B % d == 0]
    multi = [d for d in divisors if B // d >= 2]
    pool = multi if multi else divisors
    for d in pool:
        if d * S >= 128:
            return d
    return pool[-1]


def _pack_vec_bank(params):
    """Pack all (1, k) vectors into one (8, 128) f32 array (one vreg tile)."""
    width = 128
    assert 3 * D_MODEL <= width and D_FF <= width
    rows = [
        params["ln1_g"], params["ln1_b"],
        jnp.concatenate([params["bq"], params["bk"], params["bv"]], axis=-1),
        params["bo"], params["ln2_g"], params["ln2_b"],
        params["b1"], params["b2"],
    ]
    padded = [jnp.pad(r.reshape(1, -1), ((0, 0), (0, width - r.size))) for r in rows]
    return jnp.concatenate(padded, axis=0).astype(jnp.float32)   # (8, 128)


def _make_kernel(TB, S, D, H, F):
    dk = D // H
    scale = 1.0 / math.sqrt(dk)
    R = TB * S
    bf16 = jnp.bfloat16

    def kernel(x_ref, mask_ref, wqkv_ref, wo_ref, w1_ref, w2_ref, vec_ref, o_ref):
        x = x_ref[...]                                   # (R, D) f32
        vec = vec_ref[...]                               # (8, 128) f32
        ln1_g, ln1_b = vec[0:1, :D], vec[1:2, :D]
        b_qkv = vec[2:3, :3 * D]
        bo = vec[3:4, :D]
        ln2_g, ln2_b = vec[4:5, :D], vec[5:6, :D]
        b1, b2 = vec[6:7, :F], vec[7:8, :D]

        def layer_norm(z, g, b):
            # Annotated-Transformer LayerNorm: unbiased std (ddof=1), eps on std.
            mu = jnp.mean(z, axis=-1, keepdims=True)
            var = jnp.sum((z - mu) ** 2, axis=-1, keepdims=True) / (D - 1)
            inv = pl.reciprocal(jnp.sqrt(var) + EPS, approx=True)   # EUP slot
            return g * (z - mu) * inv + b

        # ---- sublayer 0: x + dropout(self_attn(norm(x)))   (dropout == identity)
        xn = layer_norm(x, ln1_g, ln1_b)
        qkv = jnp.dot(xn.astype(bf16), wqkv_ref[...],
                      preferred_element_type=jnp.float32) + b_qkv   # (R, 3D) f32
        q = qkv[:, 0 * D:1 * D].astype(bf16).reshape(TB, S, D)
        k = qkv[:, 1 * D:2 * D].astype(bf16).reshape(TB, S, D)
        v = qkv[:, 2 * D:3 * D].astype(bf16).reshape(TB, S, D)

        # Additive mask bias, computed once (0 = keep, -1e9 = masked).
        bias = (mask_ref[...] - 1.0) * 1e9               # (TB, 1, S) f32

        head_outs = []
        for h in range(H):                               # static unroll; TB-batched per head
            sl = slice(h * dk, (h + 1) * dk)
            s = jnp.einsum('bqd,bkd->bqk', q[:, :, sl], k[:, :, sl],
                           preferred_element_type=jnp.float32) * scale + bias
            m = jnp.max(s, axis=-1, keepdims=True)
            p = jnp.exp(s - m)
            p = p * pl.reciprocal(jnp.sum(p, axis=-1, keepdims=True), approx=True)
            head_outs.append(
                jnp.einsum('bqk,bkd->bqd', p.astype(bf16), v[:, :, sl],
                           preferred_element_type=jnp.float32))
        attn = jnp.concatenate(head_outs, axis=-1).reshape(R, D)
        attn = jnp.dot(attn.astype(bf16), wo_ref[...],
                       preferred_element_type=jnp.float32) + bo
        x1 = x + attn

        # ---- sublayer 1: x + dropout(feed_forward(norm(x)))
        xn2 = layer_norm(x1, ln2_g, ln2_b)
        h1 = jnp.maximum(
            jnp.dot(xn2.astype(bf16), w1_ref[...],
                    preferred_element_type=jnp.float32) + b1, 0.0)
        ff = jnp.dot(h1.astype(bf16), w2_ref[...],
                     preferred_element_type=jnp.float32) + b2
        o_ref[...] = x1 + ff

    return kernel


def encoder_layer(x, mask, params):
    B, S, D = x.shape
    assert D == D_MODEL
    F = D_FF

    TB = _choose_block_batch(B, S)
    if (TB * S) % 8 != 0 and TB != B:
        TB = B            # fall back to one full-batch block to satisfy (8,128) tiling
    R = TB * S

    # One-time wrapper-side prep: fused QKV weight, bf16 MXU weights, vec bank.
    w_qkv = jnp.concatenate([params["wq"], params["wk"], params["wv"]],
                            axis=1).astype(jnp.bfloat16)            # (D, 3D)
    wo = params["wo"].astype(jnp.bfloat16)
    w1 = params["w1"].astype(jnp.bfloat16)
    w2 = params["w2"].astype(jnp.bfloat16)
    vec = _pack_vec_bank(params)                                     # (8, 128)

    x2 = x.reshape(B * S, D)          # flatten batch*seq rows for dense matmuls
    kernel = _make_kernel(TB, S, D, N_HEADS, F)

    out = pl.pallas_call(
        kernel,
        out_shape=jax.ShapeDtypeStruct((B * S, D), jnp.float32),
        grid=(B // TB,),
        in_specs=[
            pl.BlockSpec((R, D), lambda i: (i, 0)),        # x rows
            pl.BlockSpec((TB, 1, S), lambda i: (i, 0, 0)),  # mask
            pl.BlockSpec(w_qkv.shape, lambda i: (0, 0)),    # fused QKV weight
            pl.BlockSpec(wo.shape, lambda i: (0, 0)),
            pl.BlockSpec(w1.shape, lambda i: (0, 0)),
            pl.BlockSpec(w2.shape, lambda i: (0, 0)),
            pl.BlockSpec(vec.shape, lambda i: (0, 0)),      # packed LN params + biases
        ],
        out_specs=pl.BlockSpec((R, D), lambda i: (i, 0)),
        compiler_params=pltpu.CompilerParams(dimension_semantics=("parallel",)),
    )(x2, mask, w_qkv, wo, w1, w2, vec)
    return out.reshape(B, S, D)


def init_params(key):
    ks = jax.random.split(key, 8)

    def lin(k, fan_in, fan_out):
        return (jax.random.normal(k, (fan_in, fan_out), jnp.float32)
                * (1.0 / math.sqrt(fan_in)))

    D, F = D_MODEL, D_FF
    return {
        "ln1_g": jnp.ones((1, D), jnp.float32), "ln1_b": jnp.zeros((1, D), jnp.float32),
        "wq": lin(ks[0], D, D), "bq": jnp.zeros((1, D), jnp.float32),
        "wk": lin(ks[1], D, D), "bk": jnp.zeros((1, D), jnp.float32),
        "wv": lin(ks[2], D, D), "bv": jnp.zeros((1, D), jnp.float32),
        "wo": lin(ks[3], D, D), "bo": jnp.zeros((1, D), jnp.float32),
        "ln2_g": jnp.ones((1, D), jnp.float32), "ln2_b": jnp.zeros((1, D), jnp.float32),
        "w1": lin(ks[4], D, F), "b1": jnp.zeros((1, F), jnp.float32),
        "w2": lin(ks[5], F, D), "b2": jnp.zeros((1, D), jnp.float32),
    }


def encoder_layer_ref(x, mask, params):
    """Pure-JAX reference mirroring the PyTorch forward (eval mode).

    Matmul operands are cast to bf16 (with f32 accumulation) to mirror the
    kernel's MXU precision; the comparison tolerance then only needs to absorb
    the kernel's approximate EUP reciprocals and accumulation-order deltas.
    """
    bf16 = jnp.bfloat16

    def dot(a, w):
        return jnp.dot(a.astype(bf16), w.astype(bf16),
                       preferred_element_type=jnp.float32)

    def ln(z, g, b):
        mu = jnp.mean(z, axis=-1, keepdims=True)
        var = jnp.sum((z - mu) ** 2, axis=-1, keepdims=True) / (z.shape[-1] - 1)
        return g * (z - mu) / (jnp.sqrt(var) + EPS) + b

    def one(xb, mb):                       # xb: (S, D), mb: (1, S)
        dk = D_MODEL // N_HEADS
        xn = ln(xb, params["ln1_g"], params["ln1_b"])
        q = dot(xn, params["wq"]) + params["bq"]
        k = dot(xn, params["wk"]) + params["bk"]
        v = dot(xn, params["wv"]) + params["bv"]
        outs = []
        for h in range(N_HEADS):
            sl = slice(h * dk, (h + 1) * dk)
            s = dot(q[:, sl], k[:, sl].T) / math.sqrt(dk)
            s = jnp.where(mb > 0, s, -1e9)
            p = jax.nn.softmax(s, axis=-1)
            outs.append(dot(p, v[:, sl]))
        attn = dot(jnp.concatenate(outs, axis=-1), params["wo"]) + params["bo"]
        x1 = xb + attn
        xn2 = ln(x1, params["ln2_g"], params["ln2_b"])
        ff = dot(jnp.maximum(dot(xn2, params["w1"]) + params["b1"], 0.0),
                 params["w2"]) + params["b2"]
        return x1 + ff

    return jax.vmap(one)(x, mask)


if __name__ == "__main__":
    B, S = 2, 8
    key = jax.random.PRNGKey(0)
    kx, kp = jax.random.split(key)

    x = jax.random.normal(kx, (B, S, D_MODEL), jnp.float32)
    lengths = jnp.array([S, 5])                                   # second example padded
    pos = jnp.arange(S)[None, None, :]
    mask = (pos < lengths[:, None, None]).astype(jnp.float32)     # (B, 1, S), 1.0 = keep

    params = init_params(kp)

    out = jax.block_until_ready(encoder_layer(x, mask, params))
    ref = encoder_layer_ref(x, mask, params)

    assert out.shape == (B, S, D_MODEL)
    # bf16 MXU operands + approx EUP reciprocals -> loosened tolerance vs. reference.
    assert jnp.allclose(out, ref, atol=2e-2, rtol=2e-2), "mismatch vs JAX reference"

    print("KERNEL_OK")
</pallas_src>

<mosaic_0001>
module attributes {stable_mosaic.version = 11 : i64} {
  func.func @kernel(%arg0: i32, %arg1: memref<8x32xf32, #tpu.memory_space<vmem>>, %arg2: memref<1x1x8xf32, #tpu.memory_space<vmem>>, %arg3: memref<32x96xbf16, #tpu.memory_space<vmem>>, %arg4: memref<32x32xbf16, #tpu.memory_space<vmem>>, %arg5: memref<32x64xbf16, #tpu.memory_space<vmem>>, %arg6: memref<64x32xbf16, #tpu.memory_space<vmem>>, %arg7: memref<8x128xf32, #tpu.memory_space<vmem>>, %arg8: memref<8x32xf32, #tpu.memory_space<vmem>>) attributes {dimension_semantics = [#tpu.dimension_semantics<parallel>], iteration_bounds = array<i64: 2>, scalar_prefetch = 0 : i64, scratch_operands = 0 : i64, tpu.core_type = #tpu.core_type<tc>, window_params = [{transform_indices = @transform_0, window_bounds = array<i64: 8, 32>}, {transform_indices = @transform_1, window_bounds = array<i64: 1, 1, 8>}, {pipeline_mode = #tpu.pipeline_mode<synchronous>, transform_indices = @transform_2, window_bounds = array<i64: 32, 96>}, {pipeline_mode = #tpu.pipeline_mode<synchronous>, transform_indices = @transform_3, window_bounds = array<i64: 32, 32>}, {pipeline_mode = #tpu.pipeline_mode<synchronous>, transform_indices = @transform_4, window_bounds = array<i64: 32, 64>}, {pipeline_mode = #tpu.pipeline_mode<synchronous>, transform_indices = @transform_5, window_bounds = array<i64: 64, 32>}, {pipeline_mode = #tpu.pipeline_mode<synchronous>, transform_indices = @transform_6, window_bounds = array<i64: 8, 128>}, {transform_indices = @transform_7, window_bounds = array<i64: 8, 32>}]} {
    %c0 = arith.constant 0 : index
    %c0_0 = arith.constant 0 : index
    %0 = vector.load %arg1[%c0, %c0_0] : memref<8x32xf32, #tpu.memory_space<vmem>>, vector<8x32xf32>
    %c0_1 = arith.constant 0 : index
    %c0_2 = arith.constant 0 : index
    %1 = vector.load %arg7[%c0_1, %c0_2] : memref<8x128xf32, #tpu.memory_space<vmem>>, vector<8x128xf32>
    %2 = vector.extract_strided_slice %1 {offsets = [0, 0], sizes = [1, 32], strides = [1, 1]} : vector<8x128xf32> to vector<1x32xf32>
    %3 = vector.extract_strided_slice %1 {offsets = [1, 0], sizes = [1, 32], strides = [1, 1]} : vector<8x128xf32> to vector<1x32xf32>
    %4 = vector.extract_strided_slice %1 {offsets = [2, 0], sizes = [1, 96], strides = [1, 1]} : vector<8x128xf32> to vector<1x96xf32>
    %5 = vector.extract_strided_slice %1 {offsets = [3, 0], sizes = [1, 32], strides = [1, 1]} : vector<8x128xf32> to vector<1x32xf32>
    %6 = vector.extract_strided_slice %1 {offsets = [4, 0], sizes = [1, 32], strides = [1, 1]} : vector<8x128xf32> to vector<1x32xf32>
    %7 = vector.extract_strided_slice %1 {offsets = [5, 0], sizes = [1, 32], strides = [1, 1]} : vector<8x128xf32> to vector<1x32xf32>
    %8 = vector.extract_strided_slice %1 {offsets = [6, 0], sizes = [1, 64], strides = [1, 1]} : vector<8x128xf32> to vector<1x64xf32>
    %9 = vector.extract_strided_slice %1 {offsets = [7, 0], sizes = [1, 32], strides = [1, 1]} : vector<8x128xf32> to vector<1x32xf32>
    %cst = arith.constant dense<0.000000e+00> : vector<8xf32>
    %10 = vector.multi_reduction <add>, %0, %cst [1] : vector<8x32xf32> to vector<8xf32>
    %11 = vector.shape_cast %10 : vector<8xf32> to vector<8x1xf32>
    %cst_3 = arith.constant 3.200000e+01 : f32
    %12 = vector.broadcast %cst_3 : f32 to vector<8x1xf32>
    %13 = arith.divf %11, %12 : vector<8x1xf32>
    %14 = vector.broadcast %13 : vector<8x1xf32> to vector<8x32xf32>
    %15 = arith.subf %0, %14 : vector<8x32xf32>
    %16 = arith.mulf %15, %15 : vector<8x32xf32>
    %cst_4 = arith.constant dense<0.000000e+00> : vector<8xf32>
    %17 = vector.multi_reduction <add>, %16, %cst_4 [1] : vector<8x32xf32> to vector<8xf32>
    %18 = vector.shape_cast %17 : vector<8xf32> to vector<8x1xf32>
    %cst_5 = arith.constant 3.100000e+01 : f32
    %19 = vector.broadcast %cst_5 : f32 to vector<8x1xf32>
    %20 = arith.divf %18, %19 : vector<8x1xf32>
    %21 = math.sqrt %20 : vector<8x1xf32>
    %cst_6 = arith.constant 9.99999997E-7 : f32
    %22 = vector.broadcast %cst_6 : f32 to vector<8x1xf32>
    %23 = arith.addf %21, %22 : vector<8x1xf32>
    %24 = tpu.reciprocal %23 {approx = true} : vector<8x1xf32> -> vector<8x1xf32>
    %25 = vector.broadcast %13 : vector<8x1xf32> to vector<8x32xf32>
    %26 = arith.subf %0, %25 : vector<8x32xf32>
    %27 = vector.broadcast %2 : vector<1x32xf32> to vector<8x32xf32>
    %28 = arith.mulf %27, %26 : vector<8x32xf32>
    %29 = vector.broadcast %24 : vector<8x1xf32> to vector<8x32xf32>
    %30 = arith.mulf %28, %29 : vector<8x32xf32>
    %31 = vector.broadcast %3 : vector<1x32xf32> to vector<8x32xf32>
    %32 = arith.addf %30, %31 : vector<8x32xf32>
    %33 = arith.truncf %32 : vector<8x32xf32> to vector<8x32xbf16>
    %c0_7 = arith.constant 0 : index
    %c0_8 = arith.constant 0 : index
    %34 = vector.load %arg3[%c0_7, %c0_8] : memref<32x96xbf16, #tpu.memory_space<vmem>>, vector<32x96xbf16>
    %cst_9 = arith.constant dense<0.000000e+00> : vector<8x96xf32>
    %35 = tpu.matmul %33, %34, %cst_9 {dimension_numbers = #tpu.dot_dimension_numbers<[1], [0], [0], [1], [0, 0, 1, 1], [], []>} : vector<8x32xbf16>, vector<32x96xbf16>, vector<8x96xf32> -> vector<8x96xf32>
    %36 = vector.broadcast %4 : vector<1x96xf32> to vector<8x96xf32>
    %37 = arith.addf %35, %36 : vector<8x96xf32>
    %38 = vector.extract_strided_slice %37 {offsets = [0, 0], sizes = [8, 32], strides = [1, 1]} : vector<8x96xf32> to vector<8x32xf32>
    %39 = arith.truncf %38 : vector<8x32xf32> to vector<8x32xbf16>
    %40 = vector.shape_cast %39 : vector<8x32xbf16> to vector<1x8x32xbf16>
    %41 = vector.extract_strided_slice %37 {offsets = [0, 32], sizes = [8, 32], strides = [1, 1]} : vector<8x96xf32> to vector<8x32xf32>
    %42 = arith.truncf %41 : vector<8x32xf32> to vector<8x32xbf16>
    %43 = vector.shape_cast %42 : vector<8x32xbf16> to vector<1x8x32xbf16>
    %44 = vector.extract_strided_slice %37 {offsets = [0, 64], sizes = [8, 32], strides = [1, 1]} : vector<8x96xf32> to vector<8x32xf32>
    %45 = arith.truncf %44 : vector<8x32xf32> to vector<8x32xbf16>
    %46 = vector.shape_cast %45 : vector<8x32xbf16> to vector<1x8x32xbf16>
    %c0_10 = arith.constant 0 : index
    %c0_11 = arith.constant 0 : index
    %c0_12 = arith.constant 0 : index
    %47 = vector.load %arg2[%c0_10, %c0_11, %c0_12] : memref<1x1x8xf32, #tpu.memory_space<vmem>>, vector<1x1x8xf32>
    %cst_13 = arith.constant 1.000000e+00 : f32
    %48 = vector.broadcast %cst_13 : f32 to vector<1x1x8xf32>
    %49 = arith.subf %47, %48 : vector<1x1x8xf32>
    %cst_14 = arith.constant 1.000000e+09 : f32
    %50 = vector.broadcast %cst_14 : f32 to vector<1x1x8xf32>
    %51 = arith.mulf %49, %50 : vector<1x1x8xf32>
    %52 = vector.extract_strided_slice %40 {offsets = [0, 0, 0], sizes = [1, 8, 8], strides = [1, 1, 1]} : vector<1x8x32xbf16> to vector<1x8x8xbf16>
    %53 = vector.extract_strided_slice %43 {offsets = [0, 0, 0], sizes = [1, 8, 8], strides = [1, 1, 1]} : vector<1x8x32xbf16> to vector<1x8x8xbf16>
    "tpu.trace_start"() <{level = 10 : i32, message = "bqd,bkd->bqk"}> : () -> ()
    %cst_15 = arith.constant dense<0.000000e+00> : vector<1x8x8xf32>
    %54 = tpu.matmul %52, %53, %cst_15 {dimension_numbers = #tpu.dot_dimension_numbers<[2], [2], [1], [1], [0, 0, 0, 1, 1, 1], [0], [0]>} : vector<1x8x8xbf16>, vector<1x8x8xbf16>, vector<1x8x8xf32> -> vector<1x8x8xf32>
    "tpu.trace_stop"() : () -> ()
    %cst_16 = arith.constant 0.353553385 : f32
    %55 = vector.broadcast %cst_16 : f32 to vector<1x8x8xf32>
    %56 = arith.mulf %54, %55 : vector<1x8x8xf32>
    %57 = vector.broadcast %51 : vector<1x1x8xf32> to vector<1x8x8xf32>
    %58 = arith.addf %56, %57 : vector<1x8x8xf32>
    %cst_17 = arith.constant dense<0xFF800000> : vector<1x8xf32>
    %59 = vector.multi_reduction <maximumf>, %58, %cst_17 [2] : vector<1x8x8xf32> to vector<1x8xf32>
    %60 = vector.shape_cast %59 : vector<1x8xf32> to vector<1x8x1xf32>
    %61 = vector.broadcast %60 : vector<1x8x1xf32> to vector<1x8x8xf32>
    %62 = arith.subf %58, %61 : vector<1x8x8xf32>
    %63 = math.exp %62 : vector<1x8x8xf32>
    %cst_18 = arith.constant dense<0.000000e+00> : vector<1x8xf32>
    %64 = vector.multi_reduction <add>, %63, %cst_18 [2] : vector<1x8x8xf32> to vector<1x8xf32>
    %65 = vector.shape_cast %64 : vector<1x8xf32> to vector<1x8x1xf32>
    %66 = tpu.reciprocal %65 {approx = true} : vector<1x8x1xf32> -> vector<1x8x1xf32>
    %67 = vector.broadcast %66 : vector<1x8x1xf32> to vector<1x8x8xf32>
    %68 = arith.mulf %63, %67 : vector<1x8x8xf32>
    %69 = arith.truncf %68 : vector<1x8x8xf32> to vector<1x8x8xbf16>
    %70 = vector.extract_strided_slice %46 {offsets = [0, 0, 0], sizes = [1, 8, 8], strides = [1, 1, 1]} : vector<1x8x32xbf16> to vector<1x8x8xbf16>
    "tpu.trace_start"() <{level = 10 : i32, message = "bqk,bkd->bqd"}> : () -> ()
    %cst_19 = arith.constant dense<0.000000e+00> : vector<1x8x8xf32>
    %71 = tpu.matmul %69, %70, %cst_19 {dimension_numbers = #tpu.dot_dimension_numbers<[2], [1], [1], [2], [0, 0, 0, 1, 1, 2], [0], [0]>} : vector<1x8x8xbf16>, vector<1x8x8xbf16>, vector<1x8x8xf32> -> vector<1x8x8xf32>
    "tpu.trace_stop"() : () -> ()
    %72 = vector.extract_strided_slice %40 {offsets = [0, 0, 8], sizes = [1, 8, 8], strides = [1, 1, 1]} : vector<1x8x32xbf16> to vector<1x8x8xbf16>
    %73 = vector.extract_strided_slice %43 {offsets = [0, 0, 8], sizes = [1, 8, 8], strides = [1, 1, 1]} : vector<1x8x32xbf16> to vector<1x8x8xbf16>
    "tpu.trace_start"() <{level = 10 : i32, message = "bqd,bkd->bqk"}> : () -> ()
    %cst_20 = arith.constant dense<0.000000e+00> : vector<1x8x8xf32>
    %74 = tpu.matmul %72, %73, %cst_20 {dimension_numbers = #tpu.dot_dimension_numbers<[2], [2], [1], [1], [0, 0, 0, 1, 1, 1], [0], [0]>} : vector<1x8x8xbf16>, vector<1x8x8xbf16>, vector<1x8x8xf32> -> vector<1x8x8xf32>
    "tpu.trace_stop"() : () -> ()
    %cst_21 = arith.constant 0.353553385 : f32
    %75 = vector.broadcast %cst_21 : f32 to vector<1x8x8xf32>
    %76 = arith.mulf %74, %75 : vector<1x8x8xf32>
    %77 = vector.broadcast %51 : vector<1x1x8xf32> to vector<1x8x8xf32>
    %78 = arith.addf %76, %77 : vector<1x8x8xf32>
    %cst_22 = arith.constant dense<0xFF800000> : vector<1x8xf32>
    %79 = vector.multi_reduction <maximumf>, %78, %cst_22 [2] : vector<1x8x8xf32> to vector<1x8xf32>
    %80 = vector.shape_cast %79 : vector<1x8xf32> to vector<1x8x1xf32>
    %81 = vector.broadcast %80 : vector<1x8x1xf32> to vector<1x8x8xf32>
    %82 = arith.subf %78, %81 : vector<1x8x8xf32>
    %83 = math.exp %82 : vector<1x8x8xf32>
    %cst_23 = arith.constant dense<0.000000e+00> : vector<1x8xf32>
    %84 = vector.multi_reduction <add>, %83, %cst_23 [2] : vector<1x8x8xf32> to vector<1x8xf32>
    %85 = vector.shape_cast %84 : vector<1x8xf32> to vector<1x8x1xf32>
    %86 = tpu.reciprocal %85 {approx = true} : vector<1x8x1xf32> -> vector<1x8x1xf32>
    %87 = vector.broadcast %86 : vector<1x8x1xf32> to vector<1x8x8xf32>
    %88 = arith.mulf %83, %87 : vector<1x8x8xf32>
    %89 = arith.truncf %88 : vector<1x8x8xf32> to vector<1x8x8xbf16>
    %90 = vector.extract_strided_slice %46 {offsets = [0, 0, 8], sizes = [1, 8, 8], strides = [1, 1, 1]} : vector<1x8x32xbf16> to vector<1x8x8xbf16>
    "tpu.trace_start"() <{level = 10 : i32, message = "bqk,bkd->bqd"}> : () -> ()
    %cst_24 = arith.constant dense<0.000000e+00> : vector<1x8x8xf32>
    %91 = tpu.matmul %89, %90, %cst_24 {dimension_numbers = #tpu.dot_dimension_numbers<[2], [1], [1], [2], [0, 0, 0, 1, 1, 2], [0], [0]>} : vector<1x8x8xbf16>, vector<1x8x8xbf16>, vector<1x8x8xf32> -> vector<1x8x8xf32>
    "tpu.trace_stop"() : () -> ()
    %92 = vector.extract_strided_slice %40 {offsets = [0, 0, 16], sizes = [1, 8, 8], strides = [1, 1, 1]} : vector<1x8x32xbf16> to vector<1x8x8xbf16>
    %93 = vector.extract_strided_slice %43 {offsets = [0, 0, 16], sizes = [1, 8, 8], strides = [1, 1, 1]} : vector<1x8x32xbf16> to vector<1x8x8xbf16>
    "tpu.trace_start"() <{level = 10 : i32, message = "bqd,bkd->bqk"}> : () -> ()
    %cst_25 = arith.constant dense<0.000000e+00> : vector<1x8x8xf32>
    %94 = tpu.matmul %92, %93, %cst_25 {dimension_numbers = #tpu.dot_dimension_numbers<[2], [2], [1], [1], [0, 0, 0, 1, 1, 1], [0], [0]>} : vector<1x8x8xbf16>, vector<1x8x8xbf16>, vector<1x8x8xf32> -> vector<1x8x8xf32>
    "tpu.trace_stop"() : () -> ()
    %cst_26 = arith.constant 0.353553385 : f32
    %95 = vector.broadcast %cst_26 : f32 to vector<1x8x8xf32>
    %96 = arith.mulf %94, %95 : vector<1x8x8xf32>
    %97 = vector.broadcast %51 : vector<1x1x8xf32> to vector<1x8x8xf32>
    %98 = arith.addf %96, %97 : vector<1x8x8xf32>
    %cst_27 = arith.constant dense<0xFF800000> : vector<1x8xf32>
    %99 = vector.multi_reduction <maximumf>, %98, %cst_27 [2] : vector<1x8x8xf32> to vector<1x8xf32>
    %100 = vector.shape_cast %99 : vector<1x8xf32> to vector<1x8x1xf32>
    %101 = vector.broadcast %100 : vector<1x8x1xf32> to vector<1x8x8xf32>
    %102 = arith.subf %98, %101 : vector<1x8x8xf32>
    %103 = math.exp %102 : vector<1x8x8xf32>
    %cst_28 = arith.constant dense<0.000000e+00> : vector<1x8xf32>
    %104 = vector.multi_reduction <add>, %103, %cst_28 [2] : vector<1x8x8xf32> to vector<1x8xf32>
    %105 = vector.shape_cast %104 : vector<1x8xf32> to vector<1x8x1xf32>
    %106 = tpu.reciprocal %105 {approx = true} : vector<1x8x1xf32> -> vector<1x8x1xf32>
    %107 = vector.broadcast %106 : vector<1x8x1xf32> to vector<1x8x8xf32>
    %108 = arith.mulf %103, %107 : vector<1x8x8xf32>
    %109 = arith.truncf %108 : vector<1x8x8xf32> to vector<1x8x8xbf16>
    %110 = vector.extract_strided_slice %46 {offsets = [0, 0, 16], sizes = [1, 8, 8], strides = [1, 1, 1]} : vector<1x8x32xbf16> to vector<1x8x8xbf16>
    "tpu.trace_start"() <{level = 10 : i32, message = "bqk,bkd->bqd"}> : () -> ()
    %cst_29 = arith.constant dense<0.000000e+00> : vector<1x8x8xf32>
    %111 = tpu.matmul %109, %110, %cst_29 {dimension_numbers = #tpu.dot_dimension_numbers<[2], [1], [1], [2], [0, 0, 0, 1, 1, 2], [0], [0]>} : vector<1x8x8xbf16>, vector<1x8x8xbf16>, vector<1x8x8xf32> -> vector<1x8x8xf32>
    "tpu.trace_stop"() : () -> ()
    %112 = vector.extract_strided_slice %40 {offsets = [0, 0, 24], sizes = [1, 8, 8], strides = [1, 1, 1]} : vector<1x8x32xbf16> to vector<1x8x8xbf16>
    %113 = vector.extract_strided_slice %43 {offsets = [0, 0, 24], sizes = [1, 8, 8], strides = [1, 1, 1]} : vector<1x8x32xbf16> to vector<1x8x8xbf16>
    "tpu.trace_start"() <{level = 10 : i32, message = "bqd,bkd->bqk"}> : () -> ()
    %cst_30 = arith.constant dense<0.000000e+00> : vector<1x8x8xf32>
    %114 = tpu.matmul %112, %113, %cst_30 {dimension_numbers = #tpu.dot_dimension_numbers<[2], [2], [1], [1], [0, 0, 0, 1, 1, 1], [0], [0]>} : vector<1x8x8xbf16>, vector<1x8x8xbf16>, vector<1x8x8xf32> -> vector<1x8x8xf32>
    "tpu.trace_stop"() : () -> ()
    %cst_31 = arith.constant 0.353553385 : f32
    %115 = vector.broadcast %cst_31 : f32 to vector<1x8x8xf32>
    %116 = arith.mulf %114, %115 : vector<1x8x8xf32>
    %117 = vector.broadcast %51 : vector<1x1x8xf32> to vector<1x8x8xf32>
    %118 = arith.addf %116, %117 : vector<1x8x8xf32>
    %cst_32 = arith.constant dense<0xFF800000> : vector<1x8xf32>
    %119 = vector.multi_reduction <maximumf>, %118, %cst_32 [2] : vector<1x8x8xf32> to vector<1x8xf32>
    %120 = vector.shape_cast %119 : vector<1x8xf32> to vector<1x8x1xf32>
    %121 = vector.broadcast %120 : vector<1x8x1xf32> to vector<1x8x8xf32>
    %122 = arith.subf %118, %121 : vector<1x8x8xf32>
    %123 = math.exp %122 : vector<1x8x8xf32>
    %cst_33 = arith.constant dense<0.000000e+00> : vector<1x8xf32>
    %124 = vector.multi_reduction <add>, %123, %cst_33 [2] : vector<1x8x8xf32> to vector<1x8xf32>
    %125 = vector.shape_cast %124 : vector<1x8xf32> to vector<1x8x1xf32>
    %126 = tpu.reciprocal %125 {approx = true} : vector<1x8x1xf32> -> vector<1x8x1xf32>
    %127 = vector.broadcast %126 : vector<1x8x1xf32> to vector<1x8x8xf32>
    %128 = arith.mulf %123, %127 : vector<1x8x8xf32>
    %129 = arith.truncf %128 : vector<1x8x8xf32> to vector<1x8x8xbf16>
    %130 = vector.extract_strided_slice %46 {offsets = [0, 0, 24], sizes = [1, 8, 8], strides = [1, 1, 1]} : vector<1x8x32xbf16> to vector<1x8x8xbf16>
    "tpu.trace_start"() <{level = 10 : i32, message = "bqk,bkd->bqd"}> : () -> ()
    %cst_34 = arith.constant dense<0.000000e+00> : vector<1x8x8xf32>
    %131 = tpu.matmul %129, %130, %cst_34 {dimension_numbers = #tpu.dot_dimension_numbers<[2], [1], [1], [2], [0, 0, 0, 1, 1, 2], [0], [0]>} : vector<1x8x8xbf16>, vector<1x8x8xbf16>, vector<1x8x8xf32> -> vector<1x8x8xf32>
    "tpu.trace_stop"() : () -> ()
    %132 = tpu.concatenate %71, %91, %111, %131 in 2 : vector<1x8x8xf32>, vector<1x8x8xf32>, vector<1x8x8xf32>, vector<1x8x8xf32> -> vector<1x8x32xf32>
    %133 = vector.shape_cast %132 : vector<1x8x32xf32> to vector<8x32xf32>
    %134 = arith.truncf %133 : vector<8x32xf32> to vector<8x32xbf16>
    %c0_35 = arith.constant 0 : index
    %c0_36 = arith.constant 0 : index
    %135 = vector.load %arg4[%c0_35, %c0_36] : memref<32x32xbf16, #tpu.memory_space<vmem>>, vector<32x32xbf16>
    %cst_37 = arith.constant dense<0.000000e+00> : vector<8x32xf32>
    %136 = tpu.matmul %134, %135, %cst_37 {dimension_numbers = #tpu.dot_dimension_numbers<[1], [0], [0], [1], [0, 0, 1, 1], [], []>} : vector<8x32xbf16>, vector<32x32xbf16>, vector<8x32xf32> -> vector<8x32xf32>
    %137 = vector.broadcast %5 : vector<1x32xf32> to vector<8x32xf32>
    %138 = arith.addf %136, %137 : vector<8x32xf32>
    %139 = arith.addf %0, %138 : vector<8x32xf32>
    %cst_38 = arith.constant dense<0.000000e+00> : vector<8xf32>
    %140 = vector.multi_reduction <add>, %139, %cst_38 [1] : vector<8x32xf32> to vector<8xf32>
    %141 = vector.shape_cast %140 : vector<8xf32> to vector<8x1xf32>
    %cst_39 = arith.constant 3.200000e+01 : f32
    %142 = vector.broadcast %cst_39 : f32 to vector<8x1xf32>
    %143 = arith.divf %141, %142 : vector<8x1xf32>
    %144 = vector.broadcast %143 : vector<8x1xf32> to vector<8x32xf32>
    %145 = arith.subf %139, %144 : vector<8x32xf32>
    %146 = arith.mulf %145, %145 : vector<8x32xf32>
    %cst_40 = arith.constant dense<0.000000e+00> : vector<8xf32>
    %147 = vector.multi_reduction <add>, %146, %cst_40 [1] : vector<8x32xf32> to vector<8xf32>
    %148 = vector.shape_cast %147 : vector<8xf32> to vector<8x1xf32>
    %cst_41 = arith.constant 3.100000e+01 : f32
    %149 = vector.broadcast %cst_41 : f32 to vector<8x1xf32>
    %150 = arith.divf %148, %149 : vector<8x1xf32>
    %151 = math.sqrt %150 : vector<8x1xf32>
    %cst_42 = arith.constant 9.99999997E-7 : f32
    %152 = vector.broadcast %cst_42 : f32 to vector<8x1xf32>
    %153 = arith.addf %151, %152 : vector<8x1xf32>
    %154 = tpu.reciprocal %153 {approx = true} : vector<8x1xf32> -> vector<8x1xf32>
    %155 = vector.broadcast %143 : vector<8x1xf32> to vector<8x32xf32>
    %156 = arith.subf %139, %155 : vector<8x32xf32>
    %157 = vector.broadcast %6 : vector<1x32xf32> to vector<8x32xf32>
    %158 = arith.mulf %157, %156 : vector<8x32xf32>
    %159 = vector.broadcast %154 : vector<8x1xf32> to vector<8x32xf32>
    %160 = arith.mulf %158, %159 : vector<8x32xf32>
    %161 = vector.broadcast %7 : vector<1x32xf32> to vector<8x32xf32>
    %162 = arith.addf %160, %161 : vector<8x32xf32>
    %163 = arith.truncf %162 : vector<8x32xf32> to vector<8x32xbf16>
    %c0_43 = arith.constant 0 : index
    %c0_44 = arith.constant 0 : index
    %164 = vector.load %arg5[%c0_43, %c0_44] : memref<32x64xbf16, #tpu.memory_space<vmem>>, vector<32x64xbf16>
    %cst_45 = arith.constant dense<0.000000e+00> : vector<8x64xf32>
    %165 = tpu.matmul %163, %164, %cst_45 {dimension_numbers = #tpu.dot_dimension_numbers<[1], [0], [0], [1], [0, 0, 1, 1], [], []>} : vector<8x32xbf16>, vector<32x64xbf16>, vector<8x64xf32> -> vector<8x64xf32>
    %166 = vector.broadcast %8 : vector<1x64xf32> to vector<8x64xf32>
    %167 = arith.addf %165, %166 : vector<8x64xf32>
    %cst_46 = arith.constant 0.000000e+00 : f32
    %168 = vector.broadcast %cst_46 : f32 to vector<8x64xf32>
    %169 = arith.maximumf %167, %168 : vector<8x64xf32>
    %170 = arith.truncf %169 : vector<8x64xf32> to vector<8x64xbf16>
    %c0_47 = arith.constant 0 : index
    %c0_48 = arith.constant 0 : index
    %171 = vector.load %arg6[%c0_47, %c0_48] : memref<64x32xbf16, #tpu.memory_space<vmem>>, vector<64x32xbf16>
    %cst_49 = arith.constant dense<0.000000e+00> : vector<8x32xf32>
    %172 = tpu.matmul %170, %171, %cst_49 {dimension_numbers = #tpu.dot_dimension_numbers<[1], [0], [0], [1], [0, 0, 1, 1], [], []>} : vector<8x64xbf16>, vector<64x32xbf16>, vector<8x32xf32> -> vector<8x32xf32>
    %173 = vector.broadcast %9 : vector<1x32xf32> to vector<8x32xf32>
    %174 = arith.addf %172, %173 : vector<8x32xf32>
    %175 = arith.addf %139, %174 : vector<8x32xf32>
    %c0_50 = arith.constant 0 : index
    %c0_51 = arith.constant 0 : index
    %176 = vector.load %arg8[%c0_50, %c0_51] : memref<8x32xf32, #tpu.memory_space<vmem>>, vector<8x32xf32>
    tpu.vector_store %arg8[%c0_50, %c0_51], %175 {strides = array<i32>} : memref<8x32xf32, #tpu.memory_space<vmem>>, vector<8x32xf32>,
    return
  }
  func.func @transform_0(%arg0: i32) -> (i32, i32) {
    %c0_i32 = arith.constant 0 : i32
    %c0_i32_0 = arith.constant 0 : i32
    return %arg0, %c0_i32 : i32, i32
  }
  func.func @transform_1(%arg0: i32) -> (i32, i32, i32) {
    %c0_i32 = arith.constant 0 : i32
    %c0_i32_0 = arith.constant 0 : i32
    %c0_i32_1 = arith.constant 0 : i32
    return %arg0, %c0_i32, %c0_i32_0 : i32, i32, i32
  }
  func.func @transform_2(%arg0: i32) -> (i32, i32) {
    %c0_i32 = arith.constant 0 : i32
    %c0_i32_0 = arith.constant 0 : i32
    %c0_i32_1 = arith.constant 0 : i32
    return %c0_i32, %c0_i32_0 : i32, i32
  }
  func.func @transform_3(%arg0: i32) -> (i32, i32) {
    %c0_i32 = arith.constant 0 : i32
    %c0_i32_0 = arith.constant 0 : i32
    %c0_i32_1 = arith.constant 0 : i32
    return %c0_i32, %c0_i32_0 : i32, i32
  }
  func.func @transform_4(%arg0: i32) -> (i32, i32) {
    %c0_i32 = arith.constant 0 : i32
    %c0_i32_0 = arith.constant 0 : i32
    %c0_i32_1 = arith.constant 0 : i32
    return %c0_i32, %c0_i32_0 : i32, i32
  }
  func.func @transform_5(%arg0: i32) -> (i32, i32) {
    %c0_i32 = arith.constant 0 : i32
    %c0_i32_0 = arith.constant 0 : i32
    %c0_i32_1 = arith.constant 0 : i32
    return %c0_i32, %c0_i32_0 : i32, i32
  }
  func.func @transform_6(%arg0: i32) -> (i32, i32) {
    %c0_i32 = arith.constant 0 : i32
    %c0_i32_0 = arith.constant 0 : i32
    %c0_i32_1 = arith.constant 0 : i32
    return %c0_i32, %c0_i32_0 : i32, i32
  }
  func.func @transform_7(%arg0: i32) -> (i32, i32) {
    %c0_i32 = arith.constant 0 : i32
    %c0_i32_0 = arith.constant 0 : i32
    return %arg0, %c0_i32 : i32, i32
  }
}

</mosaic_0001>

<bundles_post_ra>
// kernel: tpu_custom_call.1
= control target key start
LH: loop header
LB: loop body
LE: loop exit
PB: predicated region body
PF: predicated region fallthrough
CT: control target
= control target key end

     0   :  { %12 = vsyncpa [#allocation3], 0  ;;  %s2017_s0 = inlined_call_operand.vmem [shape: f32[16,32], index: 0, kind: input, shape index: {}]   ;;  %s2018_s1 = inlined_call_operand.vmem [shape: f32[2,1,8], index: 1, kind: input, shape index: {}]   ;;  %s2019_s2 = inlined_call_operand.vmem [shape: bf16[32,96], index: 2, kind: input, shape index: {}]   ;;  %s2020_s3 = inlined_call_operand.vmem [shape: bf16[32,32], index: 3, kind: input, shape index: {}]   ;;  %s2021_s4 = inlined_call_operand.hbm [shape: bf16[32,64], index: 4, kind: input, shape index: {}]   ;;  %s2022_s5 = inlined_call_operand.vmem [shape: bf16[64,32], index: 5, kind: input, shape index: {}]   ;;  %s2023_s6 = inlined_call_operand.hbm [shape: f32[8,128], index: 6, kind: input, shape index: {}]   ;;  %s2024_s7 = inlined_call_operand.hbm [shape: f32[16,32], index: 7, kind: output, shape index: {}]  }
   0x1   :  { %13 = vsyncpa [#allocation6], 0 }
   0x2   :  { %14 = vsyncpa [#allocation4], 0 }
   0x3   :  { %16 = vsyncpa [#allocation4 + $0x1], 0  ;;  %s1691_s24 = smov 0   ;;  %s1693_s25 = smov 0  }
   0x4   :  { %s1695_s26 = smov 0   ;;  %s1697_s27 = smov 0  }
   0x5 LB: > { %s1712_s28 = sadd.s32 4294967295, %s1628_s27   ;;  %s1239_s29 = sadd.s32 4294967294, %s1628_s27   ;;  %s1628_s27 = sphi %s1697_s27, %s2044_s27   ;;  %s1624_s26 = sphi %s1695_s26, %s2043_s26   ;;  %s1620_s25 = sphi %s1693_s25, %s2042_s25   ;;  %s1616_s24 = sphi %s1691_s24, %s2041_s24  }
   0x6   : > { %s1716_s30 = sadd.s32 1, %s1628_s27   ;;  %s186_s8 = sadd.s32 1, %s1624_s26 }
   0x7   : > { %s183_s9 = ssub.s32 %s1628_s27, %s1716_s30  ;;  %p196_p0 = scmp.ne.s32.totalorder %s1624_s26, %s1620_s25 }
   0x8   : > { %p184_p1 = scmp.eq.s32.totalorder %s183_s9, 0  ;;  %p197_p2 = scmp.eq.s32.totalorder %s1712_s28, 1 }
   0x9   : > { %p202_p3 = scmp.ne.s32.totalorder %s1620_s25, %s1616_s24  ;;  %p203_p4 = scmp.eq.s32.totalorder %s1239_s29, 1 }
   0xa   : > { %s1727_s10 = scalar_select %p184_p1, %s1624_s26, %s186_s8  }
   0xb   : > { %p1729_p5 = por %p197_p2, %p196_p0  ;;  %p1733_p6 = por %p203_p4, %p202_p3 }
   0xc   : > { %2028 = sst [smem:[#allocation11_spill]] %s1727_s10  ;;  %p1240_p7 = scmp.ge.s32.totalorder %s1628_s27, 1 }
   0xd   : > { %s2029_s11 = scalar_select %p1729_p5, 1, 0 }
   0xe   : > { %s2030_s12 = scalar_select %p1733_p6, 1, 0 }
   0xf   : > { %p210_p8 = scmp.lt.s32.totalorder %s1628_s27, 3  ;;  %p2025_p9 = scmp.eq.s32.totalorder %s1712_s28, 0 }
  0x10   : > { %s1630_s14 = smov [#allocation2]   ;;  %s1631_s17 = smov [#allocation5]  }
  0x11   : > { %p1740_p10 = pnand %p1240_p7, %p210_p8  ;;  %s228_s15 = sshll.u32 %s1630_s14, 4  ;;  %s229_s15 = int_to_ptr.vmem [resolvable:$true] %s228_s15 }
  0x12   : > { %s245_s18 = sshll.u32 %s1631_s17, 4  ;;  %s1502_s21 = scalar_lea.hbm %s2021_s4, 256  ;;  %s1752_s18 = int_to_ptr.vmem [resolvable:$true] %s245_s18 }
  0x13   : > { %s2031_s13 = scalar_select %p1740_p10, 1, 0 }
  0x14   : > { %p1400_p11 = pneg %p1740_p10  ;;  %p1503_p13 = scmp.ne.s32.totalorder %s2021_s4, %s1502_s21 }
  0x15   : > { %p1509_p3 = scmp.lt.u32.totalorder %s1502_s21, %s2021_s4 }
  0x16   : > { %p1748_p12 = pnand %p2025_p9, %p1400_p11 }
  0x18   : > { %p1504_p0 = pneg %p1748_p12 }
  0x1a   : > { %p1505_p1 = pnand %p1504_p0, %p1503_p13 }
  0x1c   : > { %p1506_p2 = pneg %p1505_p1 }
  0x1e   : > { %p1511_p4 = pnand %p1509_p3, %p1506_p2 }
  0x20   : > { %1514 = shalt.err (!%p1511_p4)
}
  0x21   : > { %s1515_s9 = scalar_lea.vmem %s229_s15, 256  ;;  %p1523_p9 = scmp.lt.s32.totalorder %s229_s15, %s229_s15 }
  0x22   : > { %p1516_p7 = scmp.ne.s32.totalorder %s229_s15, %s1515_s9  ;;  %p1524_p6 = scmp.lt.s32.totalorder %s1515_s9, %s1515_s9 }
  0x24   : > { %p1518_p8 = pnand %p1516_p7, %p1504_p0  ;;  %p1525_p5 = por %p1524_p6, %p1523_p9 }
  0x26   : > { %p1519_p11 = pneg %p1518_p8 }
  0x28   : > { %p1526_p10 = pnand %p1525_p5, %p1519_p11 }
  0x2a   : > { %1529 = shalt.err (!%p1526_p10)
}
  0x2b   : > { %s1632_s14 = smov 64   ;;  %s1633_s17 = smov 4  }
  0x2c   : > { %1403 = dma.hbm_to_vmem [thread:$0]  (!%p1748_p12), %s2021_s4, 256, %s229_s15, [#allocation3], %s1632_s14, %s1632_s14, %s1633_s17  }
  0x2d   : > { %s1530_s23 = scalar_lea.hbm %s2023_s6, 128 }
  0x2e   : > { %p1531_p13 = scmp.ne.s32.totalorder %s2023_s6, %s1530_s23  ;;  %p1537_p9 = scmp.lt.u32.totalorder %s1530_s23, %s2023_s6 }
  0x30   : > { %p1533_p5 = pnand %p1531_p13, %p1504_p0 }
  0x32   : > { %p1534_p6 = pneg %p1533_p5 }
  0x34   : > { %p1539_p10 = pnand %p1537_p9, %p1534_p6 }
  0x36   : > { %1542 = shalt.err (!%p1539_p10)
}
  0x37   : > { %s1543_s15 = scalar_lea.vmem %s1752_s18, 128  ;;  %p1551_p4 = scmp.lt.s32.totalorder %s1752_s18, %s1752_s18 }
  0x38   : > { %p1544_p1 = scmp.ne.s32.totalorder %s1752_s18, %s1543_s15  ;;  %p1552_p7 = scmp.lt.s32.totalorder %s1543_s15, %s1543_s15 }
  0x3a   : > { %p1546_p2 = pnand %p1544_p1, %p1504_p0  ;;  %p1553_p8 = por %p1552_p7, %p1551_p4 }
  0x3c   : > { %p1547_p3 = pneg %p1546_p2 }
  0x3e   : > { %p1554_p11 = pnand %p1553_p8, %p1547_p3 }
  0x40   : > { %1557 = shalt.err (!%p1554_p11)
}
  0x41   : > { %1406 = dma.hbm_to_vmem [thread:$0]  (!%p1748_p12), %s2023_s6, 128, %s1752_s18, [#allocation6]  }
  0x42   : > { %p2033_p13 = scmp.ne.s32.totalorder %s2031_s13, 0 }
  0x43   : > { %p2034_p5 = scmp.eq.s32.totalorder (!%p2033_p13), %s1712_s28, 0 }
  0x44   : > { %271 = sbr.rel (%p2033_p13) target bundleno = 2669 (0xa6d), region = 48 }
  0x4b   : > { %1603 = dma.done.wait (%p2034_p5), [#allocation3], 256   ;;  %p2035_p0 = pmov %p2034_p5 }
  0x4d   : > { %1605 = vsyncadd (%p2035_p0), [#allocation3], 4294967040  ;;  %p2036_p6 = pmov %p2035_p0 }
  0x4e   : > { %p2037_p9 = pmov %p2035_p0 }
  0x4f   : > { %1607 = dma.done.wait (%p2036_p6), [#allocation6], 128  }
  0x50   : > { %1609 = vsyncadd (%p2037_p9), [#allocation6], 4294967168  ;;  %p309_p10 = scmp.lt.s32.totalorder %s1712_s28, 1  ;;  %vm319_vm0 = vcmask 261120   ;;  %v1468_v7 = vld [vmem:[%s2019_s2] sm:$0xff]   ;;  %v1634_v8 = vmov 0.0   ;;  %v341_v13 = vlaneseq }
  0x51   : > { %1306 = vmatprep.subr.bf16.mxu0 %v1634_v8  ;;  %vm1635_vm1 = vmmov 0   ;;  %v1469_v9 = vld [vmem:[%s2019_s2 + $0x8] sm:$0xff]   ;;  %1314 = vmatprep.subr.bf16.mxu1 %v1634_v8  ;;  %v1842_v21 = vld [vmem:[#allocation5] sm:$0xff]  ;;  %s1636_s29 = smov 120   ;;  %s1637_s8 = smov 96   ;;  %vm423_vm4 = vcmask 64512  }
  0x52   : > { %s1813_s16 = scalar_select %p309_p10, %s1712_s28, 1  ;;  %1310 = vmatprep.mubr.msk.bf16.mxu0 %vm1635_vm1, %v1634_v8  ;;  %1307 = vmatpush3.bf16.msra.mxu0 %v1468_v7  ;;  %v1839_v17 = vshrl.u32 %v341_v13, 7  ;;  %vm495_vm5 = vcmask 1043456   ;;  %vm888_vm6 = vcmask 130048   ;;  %vm890_vm7 = vcmask 195584  }
  0x53   : > { %1308 = vmatprep.subr.bf16.mxu0 %v1634_v8  ;;  %1316 = vmatprep.mubr.msk.bf16.mxu1 %vm1635_vm1, %v1634_v8  ;;  %s1638_s9 = smov 88   ;;  %s1639_s15 = smov 80   ;;  %vm1089_vm10 = vcmask 523264  }
  0x54   : > { %s1248_s13 = sshll.u32 %s1813_s16, 3  ;;  %v343_v20 = vsub.s32 0, %v1839_v17  ;;  %v349_v23 = vsub.s32 1, %v1839_v17  ;;  %v359_v30 = vsub.s32 2, %v1839_v17  ;;  %s1640_s10 = smov 112  }
  0x55   : > { %s312_s19 = scalar_lea.vmem %s2017_s0, %s1248_s13  ;;  %s1641_s14 = smov 72  }
  0x56   : > { %v1819_v0 = vld [vmem:[%s312_s19] sm:$0xff]  ;;  %1309 = vmatpush3.bf16.msra.mxu0 %v1469_v9  ;;  %v344_v22 = vrot.slane %v1842_v21, %v343_v20  ;;  %v350_v25 = vrot.slane %v1842_v21, %v349_v23  ;;  %v360_v31 = vrot.slane %v1842_v21, %v359_v30  ;;  %s1642_s13 = smov 104   ;;  %s315_s19 = scalar_lea.vmem %s2018_s1, %s1813_s16 }
  0x57   : > { %v320_v1 = vsel %vm319_vm0, %v1819_v0, 0.0  ;;  %1320 = vmatprep.subr.bf16.mxu0 %v1634_v8  ;;  %v417_v49 = vld [vmem:[%s315_s19] sm:$0x1]  ;;  %s1643_s16 = smov 64   ;;  %s1644_s20 = smov 56  }
  0x58   : > { %321 = vadd.xlane.f32.xlu0 %v320_v1  ;;  %v1252_v50 = vadd.f32 -1.0, %v417_v49  ;;  %s1645_s21 = smov 48   ;;  %s1646_s22 = smov 40  }
  0x59   : > { %s1647_s23 = smov 8   ;;  %p2038_p1 = scmp.ne.s32.totalorder %s2029_s11, 0 }
  0x5a   : > { %v419_v51 = vmul.f32 1e+09, %v1252_v50  ;;  %s1650_s17 = smov [#allocation7]  }
  0x5b   : > { %s1562_s19 = sshll.u32 %s1650_s17, 4  ;;  %s1563_s19 = int_to_ptr.vmem [resolvable:$false] %s1562_s19 }
  0x5c   : > { %v475_v52 = vrot.slane %v419_v51, %v343_v20 }
  0xe5   : > { %v322_v2 = vpop.xlane.xlu0 %321 }
  0xe6   : > { %v324_v3 = vmul.f32 0.03125, %v322_v2 }
  0xe8   : > { %v325_v4 = vsub.f32 %v1819_v0, %v324_v3 }
  0xea   : > { %v326_v5 = vmul.f32 %v325_v4, %v325_v4  ;;  %v345_v24 = vmul.f32 %v344_v22, %v325_v4 }
  0xec   : > { %v327_v6 = vsel %vm319_vm0, %v326_v5, 0.0 }
  0xed   : > { %328 = vadd.xlane.f32.xlu0 %v327_v6 }
 0x17a   : > { %v329_v10 = vpop.xlane.xlu0 %328 }
 0x17b   : > { %v331_v11 = vmul.f32 0.032258064, %v329_v10 }
 0x17d   : > { %1478 = vrsqrt.f32 %v331_v11  ;;  %vm334_vm2 = vcmp.eq.f32.partialorder %v331_v11, inf  ;;  %v337_v15 = vand.u32 2147483648, %v331_v11  ;;  %vm336_vm3 = vcmp.eq.f32.partialorder %v331_v11, 0.0 }
 0x187   : > { %v1479_v12 = vpop.eup %1478 }
 0x188   : > { %v333_v14 = vmul.f32 %v1479_v12, %v331_v11 }
 0x18a   : > { %v335_v16 = vsel %vm334_vm2, %v331_v11, %v333_v14 }
 0x18b   : > { %v338_v18 = vsel %vm336_vm3, %v337_v15, %v335_v16 }
 0x18c   : > { %v339_v19 = vadd.f32 1e-06, %v338_v18 }
 0x18e   : > { %1480 = vrcp.f32 %v339_v19 }
 0x198   : > { %v1481_v26 = vpop.eup %1480 }
 0x199   : > { %v346_v27 = vmul.f32 %v1481_v26, %v345_v24 }
 0x19b   : > { %v351_v28 = vadd.f32 %v350_v25, %v346_v27 }
 0x19d   : > { %v352_v29 = vpack.c.bf16 %v351_v28, %v351_v28 }
 0x19f   : > { %1311 = vmatmul.mubr.msk.bf16.vlgmr.msra.gmra.mrb[0].mxu0 %vm319_vm0, %v352_v29 }
 0x1a0   : > { %1322 = vmatprep.mubr.msk.bf16.mxu0 %vm1635_vm1, %v1634_v8 }
 0x272   : > { %v410_v32 = vpop.f32.mrb[0].mxu0 }
 0x273   : > { %v411_v33 = vadd.f32 %v410_v32, %v360_v31  ;;  %v1312_v34 = vpop.f32.mrb[1].mxu0 }
 0x274   : > { %v413_v35 = vpop.f32.mrb[2].mxu0 }
 0x275   : > { %v1854_v36 = vpack.c.bf16 %v411_v33, %v411_v33  ;;  %v1313_v37 = vpop.f32.mrb[3].mxu0 }
 0x277   : > { %539 = vrot.lane.b32.xlu0 %v1854_v36, %s1636_s29  ;;  %421 = vrot.lane.b32.xlu1 %v1854_v36, %s1637_s8  ;;  %s1273_s8 = sshll.u32 %s1712_s28, 7 }
 0x27b   : > { %541 = vrot.lane.b32.xlu1 %v1854_v36, %s1638_s9 }
 0x27f   : > { %653 = vrot.lane.b32.xlu1 %v1854_v36, %s1639_s15 }
 0x283   : > { %651 = vrot.lane.b32.xlu1 %v1854_v36, %s1640_s10  ;;  %s1648_s10 = smov 16  }
 0x287   : > { %765 = vrot.lane.b32.xlu1 %v1854_v36, %s1641_s14  ;;  %s1649_s14 = smov 24  }
 0x28b   : > { %763 = vrot.lane.b32.xlu1 %v1854_v36, %s1642_s13  ;;  %s1974_s13 = scalar_lea.hbm %s2024_s7, %s1273_s8 }
 0x2e9   : > { %v422_v38 = vpop.permute.xlu1 %421  ;;  %v540_v43 = vpop.permute.xlu0 %539 }
 0x2ea   : > { %v428_v39 = vsel %vm423_vm4, %v422_v38, 0 }
 0x2eb   : > { %1315 = vmatpush3.bf16.xpose.msra.mxu1 %v428_v39 }
 0x2ec   : > { %1326 = vmatprep.subr.bf16.mxu1 %v1634_v8 }
 0x2ed   : > { %v542_v40 = vpop.permute.xlu1 %541 }
 0x2ee   : > { %v547_v41 = vsel %vm423_vm4, %v542_v40, 0 }
 0x2f1   : > { %v654_v42 = vpop.permute.xlu1 %653 }
 0x2f2   : > { %1317 = vmatmul.mubr.msk.bf16.vlgmr.msra.gmra.mrb[0].mxu1 %vm423_vm4, %v1854_v36  ;;  %v659_v45 = vsel %vm423_vm4, %v654_v42, 0 }
 0x2f3   : > { %1327 = vmatpush3.bf16.xpose.msra.mxu1 %v547_v41  ;;  %1328 = vmatprep.mubr.msk.bf16.mxu1 %vm1635_vm1, %v1634_v8 }
 0x2f4   : > { %1338 = vmatprep.subr.bf16.mxu1 %v1634_v8 }
 0x2f5   : > { %v652_v44 = vpop.permute.xlu1 %651 }
 0x2f9   : > { %v766_v46 = vpop.permute.xlu1 %765 }
 0x2fa   : > { %1329 = vmatmul.mubr.msk.bf16.vlgmr.msra.gmra.mrb[4].mxu1 %vm423_vm4, %v540_v43  ;;  %v771_v47 = vsel %vm423_vm4, %v766_v46, 0 }
 0x2fb   : > { %1339 = vmatpush3.bf16.xpose.msra.mxu1 %v659_v45  ;;  %1340 = vmatprep.mubr.msk.bf16.mxu1 %vm1635_vm1, %v1634_v8 }
 0x2fc   : > { %1350 = vmatprep.subr.bf16.mxu1 %v1634_v8 }
 0x2fd   : > { %v764_v48 = vpop.permute.xlu1 %763 }
 0x302   : > { %1341 = vmatmul.mubr.msk.bf16.vlgmr.msra.gmra.mrb[8].mxu1 %vm423_vm4, %v652_v44 }
 0x303   : > { %1351 = vmatpush3.bf16.xpose.msra.mxu1 %v771_v47  ;;  %1352 = vmatprep.mubr.msk.bf16.mxu1 %vm1635_vm1, %v1634_v8 }
 0x304   : > { %1362 = vmatprep.subr.bf16.mxu1 %v1634_v8 }
 0x30a   : > { %1353 = vmatmul.mubr.msk.bf16.vlgmr.msra.gmra.mrb[12].mxu1 %vm423_vm4, %v764_v48 }
 0x30b   : > { %1366 = vmatprep.mubr.msk.bf16.mxu1 %vm1635_vm1, %v1634_v8 }
 0x3c5   : > { %v464_v53 = vpop.f32.mrb[0].mxu1 }
 0x3c6   : > { %v470_v54 = vmul.f32 0.35355338, %v464_v53  ;;  %v1318_v55 = vpop.f32.mrb[1].mxu1 }
 0x3c7   : > { %v467_v56 = vpop.f32.mrb[2].mxu1 }
 0x3c8   : > { %v1319_v57 = vpop.f32.mrb[3].mxu1  ;;  %v477_v58 = vadd.f32 %v475_v52, %v470_v54 }
 0x3ca   : > { %v478_v59 = vsel %vm423_vm4, %v477_v58, -inf }
 0x3cb   : > { %479 = vmax.xlane.f32.xlu1 %v478_v59 }
 0x3cd   : > { %v583_v60 = vpop.f32.mrb[4].mxu1 }
 0x3ce   : > { %v589_v61 = vmul.f32 0.35355338, %v583_v60  ;;  %v1330_v62 = vpop.f32.mrb[5].mxu1 }
 0x3cf   : > { %v586_v63 = vpop.f32.mrb[6].mxu1 }
 0x3d0   : > { %v1331_v1 = vpop.f32.mrb[7].mxu1  ;;  %v590_v2 = vadd.f32 %v589_v61, %v475_v52 }
 0x3d2   : > { %v591_v3 = vsel %vm423_vm4, %v590_v2, -inf }
 0x3d3   : > { %592 = vmax.xlane.f32.xlu0 %v591_v3 }
 0x3d5   : > { %v695_v4 = vpop.f32.mrb[8].mxu1 }
 0x3d6   : > { %v701_v5 = vmul.f32 0.35355338, %v695_v4  ;;  %v1342_v6 = vpop.f32.mrb[9].mxu1 }
 0x3d7   : > { %v698_v7 = vpop.f32.mrb[10].mxu1 }
 0x3d8   : > { %v1343_v9 = vpop.f32.mrb[11].mxu1  ;;  %v702_v10 = vadd.f32 %v701_v5, %v475_v52 }
 0x3da   : > { %v703_v11 = vsel %vm423_vm4, %v702_v10, -inf }
 0x3db   : > { %704 = vmax.xlane.f32.xlu1 %v703_v11  ;;  %v1470_v11 = vld [vmem:[%s2020_s3] sm:$0xff]  }
 0x3dc   : > { %1363 = vmatpush3.bf16.msra.mxu1 %v1470_v11 }
 0x3dd   : > { %v807_v12 = vpop.f32.mrb[12].mxu1  ;;  %1364 = vmatprep.subr.bf16.mxu1 %v1634_v8 }
 0x3de   : > { %v813_v13 = vmul.f32 0.35355338, %v807_v12  ;;  %v1354_v14 = vpop.f32.mrb[13].mxu1  ;;  %v1471_v12 = vld [vmem:[%s2020_s3 + $0x8] sm:$0xff]  }
 0x3df   : > { %v810_v15 = vpop.f32.mrb[14].mxu1 }
 0x3e0   : > { %v1355_v16 = vpop.f32.mrb[15].mxu1  ;;  %v814_v18 = vadd.f32 %v813_v13, %v475_v52  ;;  %1365 = vmatpush3.bf16.msra.mxu1 %v1471_v12 }
 0x3e1   : > { %1378 = vmatprep.subr.bf16.mxu1 %v1634_v8 }
 0x3e2   : > { %v815_v19 = vsel %vm423_vm4, %v814_v18, -inf }
 0x3e3   : > { %816 = vmax.xlane.f32.xlu0 %v815_v19 }
 0x458   : > { %v480_v20 = vpop.xlane.xlu1 %479 }
 0x459   : > { %v481_v22 = vsub.f32 %v477_v58, %v480_v20 }
 0x45b   : > { %v482_v23 = vmul.f32 1.442695, %v481_v22 }
 0x45d   : > { %1482 = vpow2.f32 %v482_v23 }
 0x460   : > { %v593_v24 = vpop.xlane.xlu0 %592 }
 0x461   : > { %v594_v25 = vsub.f32 %v590_v2, %v593_v24 }
 0x463   : > { %v595_v26 = vmul.f32 1.442695, %v594_v25 }
 0x465   : > { %1484 = vpow2.f32 %v595_v26 }
 0x467   : > { %v1483_v27 = vpop.eup %1482 }
 0x468   : > { %v484_v28 = vsel %vm423_vm4, %v1483_v27, 0.0  ;;  %v705_v37 = vpop.xlane.xlu1 %704 }
 0x469   : > { %485 = vadd.xlane.f32.xlu1 %v484_v28  ;;  %v706_v38 = vsub.f32 %v702_v10, %v705_v37 }
 0x46b   : > { %v707_v39 = vmul.f32 1.442695, %v706_v38 }
 0x46f   : > { %v1485_v29 = vpop.eup %1484 }
 0x470   : > { %v817_v30 = vpop.xlane.xlu0 %816  ;;  %v597_v31 = vsel %vm423_vm4, %v1485_v29, 0.0 }
 0x471   : > { %v818_v32 = vsub.f32 %v814_v18, %v817_v30  ;;  %598 = vadd.xlane.f32.xlu0 %v597_v31  ;;  %v899_v30 = vsub.s32 3, %v1839_v17 }
 0x473   : > { %v819_v33 = vmul.f32 1.442695, %v818_v32  ;;  %v900_v31 = vrot.slane %v1842_v21, %v899_v30 }
 0x475   : > { %1486 = vpow2.f32 %v819_v33 }
 0x476   : > { %1488 = vpow2.f32 %v707_v39 }
 0x47a   : > { %490 = vrot.lane.b32.xlu1 %v1854_v36, %s1643_s16  ;;  %s1564_s16 = scalar_lea.vmem %s1563_s19, 256 }
 0x47f   : > { %v1487_v34 = vpop.eup %1486 }
 0x480   : > { %v821_v35 = vsel %vm423_vm4, %v1487_v34, 0.0  ;;  %v1489_v40 = vpop.eup %1488 }
 0x481   : > { %822 = vadd.xlane.f32.xlu0 %v821_v35  ;;  %v709_v41 = vsel %vm423_vm4, %v1489_v40, 0.0 }
 0x497   : > { %603 = vrot.lane.b32.xlu0 %v1854_v36, %s1644_s20 }
 0x49e   : > { %710 = vadd.xlane.f32.xlu1 %v709_v41 }
 0x4af   : > { %715 = vrot.lane.b32.xlu1 %v1854_v36, %s1645_s21 }
 0x4b3   : > { %827 = vrot.lane.b32.xlu1 %v1854_v36, %s1646_s22 }
 0x4f6   : > { %v486_v42 = vpop.xlane.xlu1 %485 }
 0x4f7   : > { %1490 = vrcp.f32 %v486_v42 }
 0x4fa   : > { %v491_v43 = vpop.permute.xlu1 %490 }
 0x4fb   : > { %v497_v44 = vsel %vm495_vm5, %v491_v43, 0 }
 0x4fc   : > { %1321 = vmatpush3.bf16.msra.mxu0 %v497_v44 }
 0x4fd   : > { %1332 = vmatprep.subr.bf16.mxu0 %v1634_v8 }
 0x4fe   : > { %v599_v46 = vpop.xlane.xlu0 %598 }
 0x4ff   : > { %1492 = vrcp.f32 %v599_v46  ;;  %v1473_v46 = vld [vmem:[#allocation2 + $0x8] sm:$0xff]  }
 0x501   : > { %v1491_v45 = vpop.eup %1490 }
 0x502   : > { %v488_v47 = vmul.f32 %v1491_v45, %v1483_v27  ;;  %v1472_v45 = vld [vmem:[#allocation2] sm:$0xff]  }
 0x504   : > { %v489_v48 = vpack.c.bf16 %v488_v47, %v488_v47  ;;  %v1475_v47 = vld [vmem:[%s2022_s5 + $0x8] sm:$0xff]  }
 0x506   : > { %1323 = vmatmul.mubr.msk.bf16.vlgmr.msra.gmra.mrb[4].mxu0 %vm423_vm4, %v489_v48 }
 0x507   : > { %1334 = vmatprep.mubr.msk.bf16.mxu0 %vm1635_vm1, %v1634_v8 }
 0x509   : > { %v1493_v36 = vpop.eup %1492 }
 0x50a   : > { %v601_v50 = vmul.f32 %v1493_v36, %v1485_v29 }
 0x50c   : > { %v602_v53 = vpack.c.bf16 %v601_v50, %v601_v50 }
 0x50e   : > { %v823_v49 = vpop.xlane.xlu0 %822 }
 0x512   : > { %v604_v51 = vpop.permute.xlu0 %603 }
 0x513   : > { %v609_v52 = vsel %vm495_vm5, %v604_v51, 0 }
 0x514   : > { %1333 = vmatpush3.bf16.msra.mxu0 %v609_v52 }
 0x515   : > { %1344 = vmatprep.subr.bf16.mxu0 %v1634_v8 }
 0x517   : > { %1335 = vmatmul.mubr.msk.bf16.vlgmr.msra.gmra.mrb[8].mxu0 %vm423_vm4, %v602_v53 }
 0x518   : > { %1346 = vmatprep.mubr.msk.bf16.mxu0 %vm1635_vm1, %v1634_v8 }
 0x52b   : > { %v711_v54 = vpop.xlane.xlu1 %710 }
 0x52c   : > { %1494 = vrcp.f32 %v711_v54 }
 0x52d   : > { %1496 = vrcp.f32 %v823_v49 }
 0x52f   : > { %v716_v55 = vpop.permute.xlu1 %715 }
 0x530   : > { %v721_v56 = vsel %vm495_vm5, %v716_v55, 0  ;;  %v978_v55 = vsub.s32 4, %v1839_v17 }
 0x531   : > { %1345 = vmatpush3.bf16.msra.mxu0 %v721_v56 }
 0x532   : > { %1356 = vmatprep.subr.bf16.mxu0 %v1634_v8  ;;  %v979_v56 = vrot.slane %v1842_v21, %v978_v55 }
 0x533   : > { %v828_v59 = vpop.permute.xlu1 %827 }
 0x534   : > { %v833_v62 = vsel %vm495_vm5, %v828_v59, 0 }
 0x536   : > { %v1495_v57 = vpop.eup %1494 }
 0x537   : > { %v713_v58 = vmul.f32 %v1495_v57, %v1489_v40  ;;  %v1497_v61 = vpop.eup %1496  ;;  %v984_v57 = vsub.s32 5, %v1839_v17 }
 0x538   : > { %v825_v63 = vmul.f32 %v1497_v61, %v1487_v34 }
 0x539   : > { %v714_v60 = vpack.c.bf16 %v713_v58, %v713_v58  ;;  %v985_v59 = vrot.slane %v1842_v21, %v984_v57 }
 0x53a   : > { %v826_v1 = vpack.c.bf16 %v825_v63, %v825_v63 }
 0x53b   : > { %1347 = vmatmul.mubr.msk.bf16.vlgmr.msra.gmra.mrb[12].mxu0 %vm423_vm4, %v714_v60 }
 0x53c   : > { %1357 = vmatpush3.bf16.msra.mxu0 %v833_v62  ;;  %1358 = vmatprep.mubr.msk.bf16.mxu0 %vm1635_vm1, %v1634_v8 }
 0x53d   : > { %1370 = vmatprep.subr.bf16.mxu0 %v1634_v8 }
 0x543   : > { %1359 = vmatmul.mubr.msk.bf16.vlgmr.msra.gmra.mrb[16].mxu0 %vm423_vm4, %v826_v1  ;;  %v1476_v1 = vld [vmem:[%s2022_s5 + $0x10] sm:$0xff]  }
 0x544   : > { %1374 = vmatprep.mubr.msk.bf16.mxu0 %vm1635_vm1, %v1634_v8  ;;  %1371 = vmatpush3.bf16.msra.mxu0 %v1472_v45 }
 0x545   : > { %1372 = vmatprep.subr.bf16.mxu0 %v1634_v8 }
 0x548   : > { %1373 = vmatpush3.bf16.msra.mxu0 %v1473_v46 }
 0x5d9   : > { %v533_v2 = vpop.f32.mrb[4].mxu0 }
 0x5da   : > { %v1324_v3 = vpop.f32.mrb[5].mxu0 }
 0x5db   : > { %v536_v4 = vpop.f32.mrb[6].mxu0  ;;  %v994_v3 = vsub.s32 6, %v1839_v17 }
 0x5dc   : > { %v1325_v5 = vpop.f32.mrb[7].mxu0 }
 0x5dd   : > { %v995_v4 = vrot.slane %v1842_v21, %v994_v3 }
 0x5ea   : > { %v645_v6 = vpop.f32.mrb[8].mxu0 }
 0x5eb   : > { %876 = vrot.lane.b32.xlu0 %v645_v6, %s1647_s23  ;;  %v1336_v7 = vpop.f32.mrb[9].mxu0  ;;  %s306_s23 = sand.u32 1, %s1620_s25  }
 0x5ec   : > { %v648_v9 = vpop.f32.mrb[10].mxu0  ;;  %s1247_s29 = sshll.u32 %s306_s23, 3  ;;  %s1136_s28 = scalar_lea.sflag [#allocation4], %s306_s23 }
 0x5ed   : > { %v1337_v10 = vpop.f32.mrb[11].mxu0  ;;  %s308_s9 = scalar_lea.vmem [#allocation7], %s1247_s29 }
 0x5ee   : > { %s1149_s15 = sshll.u32 %s308_s9, 4  ;;  %s1976_s15 = int_to_ptr.vmem [resolvable:$true] %s1149_s15 }
 0x5ef   : > { %s1558_s18 = scalar_lea.vmem %s1976_s15, 128  ;;  %p1565_p4 = scmp.lt.s32.totalorder %s1976_s15, %s1563_s19 }
 0x5f0   : > { %p1559_p12 = scmp.ne.s32.totalorder %s1976_s15, %s1558_s18  ;;  %p1566_p7 = scmp.lt.s32.totalorder %s1564_s16, %s1558_s18 }
 0x5f2   : > { %p1560_p2 = pnand %p1559_p12, %p2038_p1  ;;  %p1567_p8 = por %p1566_p7, %p1565_p4 }
 0x5f4   : > { %p1561_p3 = pneg %p1560_p2 }
 0x5f6   : > { %p1568_p11 = pnand %p1567_p8, %p1561_p3 }
 0x60e   : > { %v757_v13 = vpop.f32.mrb[12].mxu0 }
 0x60f   : > { %880 = vrot.lane.b32.xlu1 %v757_v13, %s1648_s10  ;;  %v1348_v14 = vpop.f32.mrb[13].mxu0 }
 0x610   : > { %v760_v15 = vpop.f32.mrb[14].mxu0 }
 0x611   : > { %v1349_v16 = vpop.f32.mrb[15].mxu0 }
 0x616   : > { %v869_v18 = vpop.f32.mrb[16].mxu0 }
 0x617   : > { %884 = vrot.lane.b32.xlu0 %v869_v18, %s1649_s14  ;;  %v1360_v19 = vpop.f32.mrb[17].mxu0 }
 0x618   : > { %v872_v20 = vpop.f32.mrb[18].mxu0 }
 0x619   : > { %v1361_v22 = vpop.f32.mrb[19].mxu0 }
 0x65d   : > { %v877_v23 = vpop.permute.xlu0 %876 }
 0x65e   : > { %v887_v25 = vsel %vm423_vm4, %v533_v2, %v877_v23  ;;  %v1477_v2 = vld [vmem:[%s2022_s5 + $0x18] sm:$0xff]  }
 0x681   : > { %v881_v24 = vpop.permute.xlu1 %880 }
 0x682   : > { %v889_v26 = vsel %vm888_vm6, %v887_v25, %v881_v24 }
 0x689   : > { %v885_v27 = vpop.permute.xlu0 %884 }
 0x68a   : > { %v891_v28 = vsel %vm890_vm7, %v889_v26, %v885_v27 }
 0x68b   : > { %v892_v29 = vpack.c.bf16 %v891_v28, %v891_v28 }
 0x68d   : > { %1367 = vmatmul.mubr.msk.bf16.vlgmr.msra.gmra.mrb[16].mxu1 %vm319_vm0, %v892_v29 }
 0x68e   : > { %1386 = vmatprep.mubr.msk.bf16.mxu1 %vm1635_vm1, %v1634_v8 }
 0x760   : > { %v950_v32 = vpop.f32.mrb[16].mxu1 }
 0x761   : > { %v951_v33 = vadd.f32 %v950_v32, %v900_v31  ;;  %v1368_v34 = vpop.f32.mrb[17].mxu1 }
 0x762   : > { %v953_v35 = vpop.f32.mrb[18].mxu1 }
 0x763   : > { %v1937_v37 = vadd.f32 %v951_v33, %v1819_v0  ;;  %v1369_v38 = vpop.f32.mrb[19].mxu1  ;;  %v1474_v0 = vld [vmem:[%s2022_s5] sm:$0xff]  }
 0x764   : > { %1379 = vmatpush3.bf16.msra.mxu1 %v1474_v0 }
 0x765   : > { %v957_v39 = vsel %vm319_vm0, %v1937_v37, 0.0  ;;  %1380 = vmatprep.subr.bf16.mxu1 %v1634_v8 }
 0x766   : > { %958 = vadd.xlane.f32.xlu1 %v957_v39 }
 0x768   : > { %1381 = vmatpush3.bf16.msra.mxu1 %v1475_v47 }
 0x769   : > { %1382 = vmatprep.subr.bf16.mxu1 %v1634_v8 }
 0x76c   : > { %1383 = vmatpush3.bf16.msra.mxu1 %v1476_v1 }
 0x76d   : > { %1384 = vmatprep.subr.bf16.mxu1 %v1634_v8  ;;  %v1063_v8 = vsub.s32 7, %v1839_v17 }
 0x76f   : > { %v1064_v13 = vrot.slane %v1842_v21, %v1063_v8 }
 0x770   : > { %1385 = vmatpush3.bf16.msra.mxu1 %v1477_v2 }
 0x7f3   : > { %v959_v40 = vpop.xlane.xlu1 %958 }
 0x7f4   : > { %v960_v41 = vmul.f32 0.03125, %v959_v40 }
 0x7f6   : > { %v961_v42 = vsub.f32 %v1937_v37, %v960_v41 }
 0x7f8   : > { %v962_v43 = vmul.f32 %v961_v42, %v961_v42  ;;  %v980_v58 = vmul.f32 %v979_v56, %v961_v42 }
 0x7fa   : > { %v963_v44 = vsel %vm319_vm0, %v962_v43, 0.0 }
 0x7fb   : > { %964 = vadd.xlane.f32.xlu0 %v963_v44 }
 0x888   : > { %v965_v48 = vpop.xlane.xlu0 %964 }
 0x889   : > { %v966_v36 = vmul.f32 0.032258064, %v965_v48 }
 0x88b   : > { %1498 = vrsqrt.f32 %v966_v36  ;;  %vm969_vm8 = vcmp.eq.f32.partialorder %v966_v36, inf  ;;  %v972_v51 = vand.u32 2147483648, %v966_v36  ;;  %vm971_vm9 = vcmp.eq.f32.partialorder %v966_v36, 0.0 }
 0x895   : > { %v1499_v49 = vpop.eup %1498 }
 0x896   : > { %v968_v50 = vmul.f32 %v1499_v49, %v966_v36 }
 0x898   : > { %v970_v52 = vsel %vm969_vm8, %v966_v36, %v968_v50 }
 0x899   : > { %v973_v53 = vsel %vm971_vm9, %v972_v51, %v970_v52 }
 0x89a   : > { %v974_v54 = vadd.f32 1e-06, %v973_v53 }
 0x89c   : > { %1500 = vrcp.f32 %v974_v54 }
 0x8a6   : > { %v1501_v60 = vpop.eup %1500 }
 0x8a7   : > { %v981_v61 = vmul.f32 %v1501_v60, %v980_v58 }
 0x8a9   : > { %v986_v62 = vadd.f32 %v985_v59, %v981_v61 }
 0x8ab   : > { %v987_v63 = vpack.c.bf16 %v986_v62, %v986_v62 }
 0x8ad   : > { %1375 = vmatmul.mubr.msk.bf16.vlgmr.msra.gmra.mrb[20].mxu0 %vm319_vm0, %v987_v63 }
 0x980   : > { %v1045_v5 = vpop.f32.mrb[20].mxu0 }
 0x981   : > { %v1046_v6 = vadd.f32 %v1045_v5, %v995_v4  ;;  %v1376_v7 = vpop.f32.mrb[21].mxu0 }
 0x982   : > { %v1048_v9 = vpop.f32.mrb[22].mxu0 }
 0x983   : > { %v1051_v10 = vmax.f32 %v1046_v6, 0.0  ;;  %v1377_v11 = vpop.f32.mrb[23].mxu0 }
 0x985   : > { %v1052_v12 = vpack.c.bf16 %v1051_v10, %v1051_v10 }
 0x987   : > { %1387 = vmatmul.mubr.msk.bf16.vlgmr.msra.gmra.mrb[20].mxu1 %vm1089_vm10, %v1052_v12 }
 0xa5a   : > { %v1127_v14 = vpop.f32.mrb[20].mxu1 }
 0xa5b   : > { %v1128_v15 = vadd.f32 %v1127_v14, %v1064_v13  ;;  %v1388_v16 = vpop.f32.mrb[21].mxu1 }
 0xa5c   : > { %v1130_v18 = vpop.f32.mrb[22].mxu1 }
 0xa5d   : > { %v1133_v19 = vadd.f32 %v1128_v15, %v1937_v37  ;;  %v1389_v20 = vpop.f32.mrb[23].mxu1 }
 0xa5f   : > { %1134 = vst.msk [vmem:[%s308_s9] sm:$0xff] %vm319_vm0, %v1133_v19 }
 0xa60   : > { %1571 = shalt.err (!%p1568_p11)
}
 0xa61   : > { %s1572_s20 = scalar_lea.hbm %s1974_s13, 128  ;;  %s1576_s23 = scalar_lea.hbm %s2024_s7, 256 }
 0xa62   : > { %p1573_p13 = scmp.ne.s32.totalorder %s1974_s13, %s1572_s20  ;;  %p1577_p6 = scmp.lt.u32.totalorder %s1974_s13, %s2024_s7 }
 0xa63   : > { %p1578_p9 = scmp.lt.u32.totalorder %s1576_s23, %s1572_s20  ;;  %p1580_p12 = scmp.lt.u32.totalorder %s1572_s20, %s1974_s13 }
 0xa64   : > { %p1574_p5 = pnand %p1573_p13, %p2038_p1 }
 0xa65   : > { %p1579_p10 = por %p1578_p9, %p1577_p6 }
 0xa66   : > { %p1575_p0 = pneg %p1574_p5 }
 0xa67   : > { %p1581_p2 = por %p1580_p12, %p1579_p10 }
 0xa69   : > { %p1582_p3 = pnand %p1581_p2, %p1575_p0 }
 0xa6b   : > { %1585 = shalt.err (!%p1582_p3)
}
 0xa6c   : > { %1398 = dma.vmem_to_hbm [thread:$0]  (%p2038_p1), %s1976_s15, 128, %s1974_s13, %s1136_s28  }
 0xa6d PF: > { %p1415_p4 = scmp.ge.s32.totalorder %s1628_s27, 2  ;;  %s1161_s9 = sand.u32 1, %s1616_s24  }
 0xa6e   : > { %p2039_p7 = scmp.ne.s32.totalorder %s2030_s12, 0  ;;  %s1162_s10 = scalar_lea.sflag [#allocation4], %s1161_s9 }
 0xa70   : > { %p1408_p8 = pnand %p1415_p4, %p2039_p7 }
 0xa72   : > { %1611 = dma.done.wait (!%p1408_p8), %s1162_s10, 128  }
 0xa73   : > { %1613 = vsyncadd (!%p1408_p8), %s1162_s10, 4294967168  ;;  %s2040_s14 = sld [smem:[#allocation11_spill]]  ;;  %p19_p11 = scmp.ge.s32.totalorder %s1716_s30, 4  }
 0xa74   : > { %s2041_s24 = smov %s1620_s25  ;;  %s2042_s25 = smov %s1624_s26 }
 0xa75   : > { %s2044_s27 = smov %s1716_s30  ;;  %21 = sbr.rel (!%p19_p11) target bundleno = 5 (0x5), region = 95 }
 0xa79   : > { %s2043_s26 = smov %s2040_s14 }
 0xa7c   :  { %1167 = vsyncpa [#allocation3], 1 }
 0xa7d   :  { %1169 = vsyncpa [#allocation3 + $0x1], 1 }
 0xa7e   :  { %1170 = vsyncpa [#allocation6], 1 }
 0xa7f   :  { %1171 = vsyncpa [#allocation4], 1 }
 0xa80   :  { %1173 = vsyncpa [#allocation4 + $0x1], 1 }

</bundles_post_ra>
